<compile_context>
chip_gen: v6e
topology: v6e:2x2x1
jax: 0.10.0
libtpu: 0.0.40
codegen_flags: <defaults>
</compile_context>

<pallas_src>
import functools

import jax
import jax.numpy as jnp
from jax.experimental import pallas as pl
from jax.experimental.pallas import tpu as pltpu

_LANES = 128
_SUBLANES = 8
_TARGET_STEP_BYTES = 4 * 1024 * 1024   # combined input payload per grid step
_FASTPATH_ELEMS = 131072               # below this, plain XLA beats launch cost


def _accuracy_partial_kernel(out_ref, tgt_ref, part_ref, *,
                             num_tiles, rows_in_last):
    """One grid step: count matches in a (blk_rows, 128) tile.

    Writes an (8, 128) int32 block where every sublane holds the per-lane
    partial counts (the wrapper reads sublane 0 of each block).
    """

    def _count(valid_rows):
        eq = out_ref[...] == tgt_ref[...]          # native dtypes, VPU promote
        if valid_rows is not None:                 # masked epilogue (last tile)
            r = jax.lax.broadcasted_iota(jnp.int32, eq.shape, 0)
            eq = eq & (r < valid_rows)
        colsum = jnp.sum(eq.astype(jnp.int32), axis=0, keepdims=True)
        part_ref[...] = jnp.broadcast_to(colsum, part_ref.shape)

    if rows_in_last is None:
        # Every tile (including the last) is fully valid: no masking at all.
        _count(None)
    else:
        i = pl.program_id(0)
        last = num_tiles - 1

        @pl.when(i != last)
        def _():
            _count(None)

        @pl.when(i == last)
        def _():
            _count(rows_in_last)


def classify_accuracy(output, target, *, tile_rows=None,
                      min_kernel_elems=_FASTPATH_ELEMS):
    """Pallas equivalent of ClassifyAccuracy.forward(output, target)."""
    output = jnp.asarray(output)
    target = jnp.asarray(target)
    assert output.shape == target.shape, (output.shape, target.shape)

    denom = jnp.float32(output.shape[0])           # len(output) in PyTorch
    total = int(output.size)

    # Small-input fast path: pallas_call launch + follow-up reduce dominate.
    if total <= max(min_kernel_elems, _LANES):
        correct = jnp.sum((output == target).astype(jnp.int32))
        # PyTorch: .float() is float32 and the in-place divide stays float32.
        return correct.astype(jnp.float32) / denom

    flat_out = output.reshape(-1)                  # contiguous -> metadata only
    flat_tgt = target.reshape(-1)

    aligned = (total // _LANES) * _LANES
    tail = total - aligned
    if tail:
        # <128-element ragged tail summed in plain XLA; the kernel only sees
        # the lane-aligned prefix (no full-array pad/concat pass).
        # TODO(synk): XLA may still materialize the prefix slice as a copy for
        # ragged lengths; a manual-DMA 1-D kernel would avoid even that.
        tail_correct = jnp.sum(
            (flat_out[aligned:] == flat_tgt[aligned:]).astype(jnp.int32))
        flat_out = flat_out[:aligned]
        flat_tgt = flat_tgt[:aligned]
    else:
        tail_correct = None

    rows = aligned // _LANES
    out2d = flat_out.reshape(rows, _LANES)
    tgt2d = flat_tgt.reshape(rows, _LANES)

    # Dtype-aware tile size: ~_TARGET_STEP_BYTES of combined input payload per
    # grid step (int32+int32 -> 4096 rows, int16 -> 8192, int8 -> 16384, ...).
    if tile_rows is None:
        bytes_per_row = _LANES * (out2d.dtype.itemsize + tgt2d.dtype.itemsize)
        tile_rows = max(_SUBLANES,
                        (_TARGET_STEP_BYTES // bytes_per_row)
                        // _SUBLANES * _SUBLANES)

    if rows <= tile_rows:
        blk_rows = rows                            # single full-extent block
        num_tiles = 1
        rows_in_last = None                        # fully valid, never mask
    else:
        blk_rows = max(_SUBLANES, (tile_rows // _SUBLANES) * _SUBLANES)
        num_tiles = -(-rows // blk_rows)
        rem = rows - (num_tiles - 1) * blk_rows
        rows_in_last = None if rem == blk_rows else rem

    kernel = functools.partial(_accuracy_partial_kernel,
                               num_tiles=num_tiles, rows_in_last=rows_in_last)

    partials = pl.pallas_call(
        kernel,
        out_shape=jax.ShapeDtypeStruct((num_tiles * _SUBLANES, _LANES),
                                       jnp.int32),
        grid=(num_tiles,),
        in_specs=[
            pl.BlockSpec((blk_rows, _LANES), lambda i: (i, 0)),
            pl.BlockSpec((blk_rows, _LANES), lambda i: (i, 0)),
        ],
        out_specs=pl.BlockSpec((_SUBLANES, _LANES), lambda i: (i, 0)),
        compiler_params=pltpu.CompilerParams(
            # No carried state -> "parallel" (megacore-shardable on v7x).
            # TODO(synk): verify v7x shards this axis across both TCs; if not,
            # switch to pltpu.CORE_PARALLEL.
            dimension_semantics=("parallel",),
            vmem_limit_bytes=32 * 1024 * 1024),
    )(out2d, tgt2d)

    # Sublane 0 of every (8, 128) block holds the per-lane partial counts.
    # Exact int32 accumulate; only overflows past 2^31 matching elements.
    correct = jnp.sum(partials.reshape(num_tiles, _SUBLANES, _LANES)[:, 0, :])
    if tail_correct is not None:
        correct = correct + tail_correct
    # PyTorch: .float() is float32 and the in-place divide stays float32.
    return correct.astype(jnp.float32) / denom


if __name__ == "__main__":
    key = jax.random.PRNGKey(0)
    ks = jax.random.split(key, 10)

    def ref_acc(o, t):
        return jnp.sum((o == t).astype(jnp.float32)) / jnp.float32(o.shape[0])

    # Case 1: 2-D int32 labels; small tile_rows forces a multi-tile grid with
    # a masked (partial) last tile: rows=300, blk=128 -> 3 tiles, last has 44.
    o1 = jax.random.randint(ks[0], (300, 128), 0, 10, dtype=jnp.int32)
    t1 = jax.random.randint(ks[1], (300, 128), 0, 10, dtype=jnp.int32)
    a1 = classify_accuracy(o1, t1, tile_rows=128, min_kernel_elems=1024)

    # Case 2: int16 labels; single full-extent block, dtype-scaled default tile.
    o2 = jax.random.randint(ks[2], (250, 128), 0, 5).astype(jnp.int16)
    t2 = jax.random.randint(ks[3], (250, 128), 0, 5).astype(jnp.int16)
    a2 = classify_accuracy(o2, t2, min_kernel_elems=1024)

    # Case 3: ragged 1-D length (not lane-aligned): aligned prefix in the
    # kernel (5 tiles of 64 rows, masked epilogue) + 100-element XLA tail.
    n3 = 38500
    o3 = jax.random.randint(ks[4], (n3,), 0, 10, dtype=jnp.int32)
    t3 = jax.random.randint(ks[5], (n3,), 0, 10, dtype=jnp.int32)
    a3 = classify_accuracy(o3, t3, tile_rows=64, min_kernel_elems=1024)

    # Case 4: mixed dtypes (int8 vs int32) promoted inside the kernel.
    o4 = jax.random.randint(ks[6], (160, 128), 0, 4).astype(jnp.int8)
    t4 = jax.random.randint(ks[7], (160, 128), 0, 4, dtype=jnp.int32)
    a4 = classify_accuracy(o4, t4, min_kernel_elems=1024)

    # Case 5: tiny input -> plain-XLA fast path (default threshold).
    o5 = jax.random.randint(ks[8], (200,), 0, 10, dtype=jnp.int32)
    t5 = jax.random.randint(ks[9], (200,), 0, 10, dtype=jnp.int32)
    a5 = classify_accuracy(o5, t5)

    results = jax.block_until_ready((a1, a2, a3, a4, a5))
    refs = (ref_acc(o1, t1), ref_acc(o2, t2), ref_acc(o3, t3),
            ref_acc(o4, t4), ref_acc(o5, t5))
    for got, want in zip(results, refs):
        assert jnp.allclose(got, want, rtol=1e-6, atol=1e-6), (got, want)

    print("KERNEL_OK")
</pallas_src>

<mosaic_0001>
module attributes {stable_mosaic.version = 11 : i64} {
  func.func @_accuracy_partial_kernel(%arg0: i32, %arg1: memref<128x128xi32, #tpu.memory_space<vmem>>, %arg2: memref<128x128xi32, #tpu.memory_space<vmem>>, %arg3: memref<8x128xi32, #tpu.memory_space<vmem>>) attributes {dimension_semantics = [#tpu.dimension_semantics<parallel>], iteration_bounds = array<i64: 3>, scalar_prefetch = 0 : i64, scratch_operands = 0 : i64, tpu.core_type = #tpu.core_type<tc>, window_params = [{transform_indices = @transform_0, window_bounds = array<i64: 128, 128>}, {transform_indices = @transform_1, window_bounds = array<i64: 128, 128>}, {transform_indices = @transform_2, window_bounds = array<i64: 8, 128>}]} {
    %c2_i32 = arith.constant 2 : i32
    %0 = arith.cmpi ne, %arg0, %c2_i32 : i32
    %1 = arith.extui %0 : i1 to i32
    %c0_i32 = arith.constant 0 : i32
    %2 = arith.cmpi ne, %1, %c0_i32 : i32
    scf.if %2 {
      %c0 = arith.constant 0 : index
      %c0_2 = arith.constant 0 : index
      %6 = vector.load %arg1[%c0, %c0_2] : memref<128x128xi32, #tpu.memory_space<vmem>>, vector<128x128xi32>
      %c0_3 = arith.constant 0 : index
      %c0_4 = arith.constant 0 : index
      %7 = vector.load %arg2[%c0_3, %c0_4] : memref<128x128xi32, #tpu.memory_space<vmem>>, vector<128x128xi32>
      %8 = arith.cmpi eq, %6, %7 : vector<128x128xi32>
      %9 = arith.extui %8 : vector<128x128xi1> to vector<128x128xi32>
      %cst = arith.constant dense<0> : vector<128xi32>
      %10 = vector.multi_reduction <add>, %9, %cst [0] : vector<128x128xi32> to vector<128xi32>
      %11 = vector.shape_cast %10 : vector<128xi32> to vector<1x128xi32>
      %12 = vector.shape_cast %11 : vector<1x128xi32> to vector<1x128xi32>
      %13 = vector.broadcast %12 : vector<1x128xi32> to vector<8x128xi32>
      %c0_5 = arith.constant 0 : index
      %c0_6 = arith.constant 0 : index
      %14 = vector.load %arg3[%c0_5, %c0_6] : memref<8x128xi32, #tpu.memory_space<vmem>>, vector<8x128xi32>
      tpu.vector_store %arg3[%c0_5, %c0_6], %13 {strides = array<i32>} : memref<8x128xi32, #tpu.memory_space<vmem>>, vector<8x128xi32>,
    } else {
    }
    %c2_i32_0 = arith.constant 2 : i32
    %3 = arith.cmpi eq, %arg0, %c2_i32_0 : i32
    %4 = arith.extui %3 : i1 to i32
    %c0_i32_1 = arith.constant 0 : i32
    %5 = arith.cmpi ne, %4, %c0_i32_1 : i32
    scf.if %5 {
      %c0 = arith.constant 0 : index
      %c0_2 = arith.constant 0 : index
      %6 = vector.load %arg1[%c0, %c0_2] : memref<128x128xi32, #tpu.memory_space<vmem>>, vector<128x128xi32>
      %c0_3 = arith.constant 0 : index
      %c0_4 = arith.constant 0 : index
      %7 = vector.load %arg2[%c0_3, %c0_4] : memref<128x128xi32, #tpu.memory_space<vmem>>, vector<128x128xi32>
      %8 = arith.cmpi eq, %6, %7 : vector<128x128xi32>
      %9 = tpu.iota {dimensions = array<i32: 0>} : vector<128x128xi32>
      %c44_i32 = arith.constant 44 : i32
      %10 = vector.broadcast %c44_i32 : i32 to vector<128x128xi32>
      %11 = arith.cmpi slt, %9, %10 : vector<128x128xi32>
      %12 = arith.andi %8, %11 : vector<128x128xi1>
      %13 = arith.extui %12 : vector<128x128xi1> to vector<128x128xi32>
      %cst = arith.constant dense<0> : vector<128xi32>
      %14 = vector.multi_reduction <add>, %13, %cst [0] : vector<128x128xi32> to vector<128xi32>
      %15 = vector.shape_cast %14 : vector<128xi32> to vector<1x128xi32>
      %16 = vector.shape_cast %15 : vector<1x128xi32> to vector<1x128xi32>
      %17 = vector.broadcast %16 : vector<1x128xi32> to vector<8x128xi32>
      %c0_5 = arith.constant 0 : index
      %c0_6 = arith.constant 0 : index
      %18 = vector.load %arg3[%c0_5, %c0_6] : memref<8x128xi32, #tpu.memory_space<vmem>>, vector<8x128xi32>
      tpu.vector_store %arg3[%c0_5, %c0_6], %17 {strides = array<i32>} : memref<8x128xi32, #tpu.memory_space<vmem>>, vector<8x128xi32>,
    } else {
    }
    return
  }
  func.func @transform_0(%arg0: i32) -> (i32, i32) {
    %c0_i32 = arith.constant 0 : i32
    %c0_i32_0 = arith.constant 0 : i32
    return %arg0, %c0_i32 : i32, i32
  }
  func.func @transform_1(%arg0: i32) -> (i32, i32) {
    %c0_i32 = arith.constant 0 : i32
    %c0_i32_0 = arith.constant 0 : i32
    return %arg0, %c0_i32 : i32, i32
  }
  func.func @transform_2(%arg0: i32) -> (i32, i32) {
    %c0_i32 = arith.constant 0 : i32
    %c0_i32_0 = arith.constant 0 : i32
    return %arg0, %c0_i32 : i32, i32
  }
}

</mosaic_0001>

<bundles_post_ra>
// kernel: tpu_custom_call.1
= control target key start
LH: loop header
LB: loop body
LE: loop exit
PB: predicated region body
PF: predicated region fallthrough
CT: control target
= control target key end

     0   :  { %7 = vsyncpa [#allocation3], 0  ;;  %s1042_s0 = inlined_call_operand.hbm [shape: s32[300,128], index: 0, kind: input, shape index: {}]   ;;  %s1043_s1 = inlined_call_operand.hbm [shape: s32[300,128], index: 1, kind: input, shape index: {}]   ;;  %s1044_s2 = inlined_call_operand.hbm [shape: s32[24,128], index: 2, kind: output, shape index: {}]  }
   0x1   :  { %9 = vsyncpa [#allocation3 + $0x1], 0 }
   0x2   :  { %10 = vsyncpa [#allocation6], 0 }
   0x3   :  { %12 = vsyncpa [#allocation6 + $0x1], 0 }
   0x4   :  { %13 = vsyncpa [#allocation4], 0 }
   0x5   :  { %15 = vsyncpa [#allocation4 + $0x1], 0  ;;  %s782_s9 = smov 0   ;;  %s784_s10 = smov 0  }
   0x6   :  { %s786_s11 = smov 0   ;;  %s788_s12 = smov 0  }
   0x7 LB: > { %s803_s13 = sadd.s32 4294967295, %s756_s12   ;;  %s560_s14 = sadd.s32 4294967294, %s756_s12   ;;  %s756_s12 = sphi %s788_s12, %s1057_s12   ;;  %s752_s11 = sphi %s786_s11, %s1056_s11   ;;  %s748_s10 = sphi %s784_s10, %s1055_s10   ;;  %s744_s9 = sphi %s782_s9, %s1054_s9  }
   0x8   : > { %s807_s15 = sadd.s32 1, %s756_s12   ;;  %s28_s16 = sadd.s32 1, %s752_s11 }
   0x9   : > { %s25_s17 = ssub.s32 %s756_s12, %s807_s15  ;;  %p35_p0 = scmp.ne.s32.totalorder %s752_s11, %s748_s10 }
   0xa   : > { %p26_p1 = scmp.eq.s32.totalorder %s25_s17, 0  ;;  %p36_p2 = scmp.eq.s32.totalorder %s756_s12, 0 }
   0xb   : > { %p41_p3 = scmp.ne.s32.totalorder %s748_s10, %s744_s9  ;;  %p42_p4 = scmp.eq.s32.totalorder %s803_s13, 0 }
   0xc   : > { %s819_s18 = scalar_select %p26_p1, %s752_s11, %s28_s16  }
   0xd   : > { %p821_p5 = por %p36_p2, %p35_p0  ;;  %p825_p6 = por %p42_p4, %p41_p3 }
   0xe   : > { %p1045_p7 = scmp.eq.s32.totalorder %s803_s13, 2  ;;  %p97_p8 = scmp.eq.s32.totalorder %s560_s14, 2 }
   0xf   : > { %p562_p11 = scmp.ge.s32.totalorder %s756_s12, 3 }
  0x10   : > { %p832_p9 = por %p1045_p7, %p35_p0  ;;  %p836_p10 = por %p97_p8, %p41_p3 }
  0x11   : > { %113 = sbr.rel (%p562_p11) target bundleno = 86 (0x56), region = 16 }
  0x12   : > { %s1049_s21 = scalar_select %p832_p9, 1, 0 }
  0x13   : > { %s1050_s22 = scalar_select %p836_p10, 1, 0 }
  0x16   : > { %116 = sbr.rel (!%p821_p5) target bundleno = 54 (0x36), region = 20  ;;  %s117_s23 = sand.u32 (%p821_p5), 1, %s752_s11  }
  0x17   : > { %s564_s24 = sshll.u32 (%p821_p5), %s756_s12, 4  ;;  %s563_s25 = sshll.u32 (%p821_p5), %s117_s23, 7 }
  0x18   : > { %s123_s26 = ssub.s32 (%p821_p5), 38, %s564_s24  ;;  %s848_s29 = scalar_lea.sflag (%p821_p5), [#allocation3], %s117_s23 }
  0x19   : > { %p124_p12 = scmp.lt.s32.totalorder (%p821_p5), %s123_s26, 16  ;;  %s121_s30 = scalar_lea.vmem (%p821_p5), [#allocation2], %s563_s25 }
  0x1b   : > { %s1059_s26 = smov (!%p124_p12, %s123_s26), 16 }
  0x1c   : > { %s845_s27 = sshll.u32 %s1059_s26, 7 }
  0x1d   : > { %s128_s28 = ssub.s32 2048, %s845_s27 }
  0x1e   : > { %129 = vsyncadd %s848_s29, %s128_s28  ;;  %p566_p13 = scmp.ne.s32.totalorder %s845_s27, 0  ;;  %s587_s3 = sshll.u32 %s756_s12, 11 }
  0x1f   : > { %s856_s6 = scalar_lea.hbm %s1042_s0, %s587_s3  ;;  %s134_s7 = sshll.u32 %s121_s30, 4  ;;  %s858_s7 = int_to_ptr.vmem [resolvable:$true] %s134_s7 }
  0x20   : > { %s636_s8 = scalar_lea.hbm %s856_s6, %s845_s27  ;;  %s640_s17 = scalar_lea.hbm %s1042_s0, 4864 }
  0x21   : > { %p637_p0 = scmp.ne.s32.totalorder %s856_s6, %s636_s8  ;;  %p641_p3 = scmp.lt.s32.totalorder %s856_s6, %s1042_s0 }
  0x22   : > { %p642_p4 = scmp.lt.s32.totalorder %s640_s17, %s636_s8 }
  0x23   : > { %p638_p1 = pnand %p637_p0, %p566_p13 }
  0x24   : > { %p643_p8 = por %p642_p4, %p641_p3 }
  0x25   : > { %p639_p2 = pneg %p638_p1 }
  0x27   : > { %p644_p11 = pnand %p643_p8, %p639_p2 }
  0x29   : > { %647 = shalt.err (!%p644_p11)
}
  0x2a   : > { %s648_s25 = scalar_lea.vmem %s858_s7, %s845_s27  ;;  %s758_s26 = smov [#allocation2]  }
  0x2b   : > { %p649_p12 = scmp.ne.s32.totalorder %s858_s7, %s648_s25  ;;  %s652_s28 = sshll.u32 %s758_s26, 4  ;;  %s653_s28 = int_to_ptr.vmem [resolvable:$false] %s652_s28 }
  0x2c   : > { %s654_s30 = scalar_lea.vmem %s653_s28, 4096  ;;  %p655_p7 = scmp.lt.s32.totalorder %s858_s7, %s653_s28 }
  0x2d   : > { %p650_p0 = pnand %p649_p12, %p566_p13  ;;  %p656_p10 = scmp.lt.s32.totalorder %s654_s30, %s648_s25 }
  0x2f   : > { %p651_p1 = pneg %p650_p0  ;;  %p657_p9 = por %p656_p10, %p655_p7 }
  0x31   : > { %p658_p3 = pnand %p657_p9, %p651_p1 }
  0x33   : > { %661 = shalt.err (!%p658_p3)
}
  0x34   : > { %s759_s3 = smov 128   ;;  %s760_s4 = smov 8  }
  0x35   : > { %140 = dma.hbm_to_vmem [thread:$0]  (%p566_p13), %s856_s6, %s845_s27, %s858_s7, %s848_s29, %s759_s3, %s759_s3, %s760_s4  }
  0x36 PF: > { %143 = sbr.rel (!%p821_p5) target bundleno = 86 (0x56), region = 24  ;;  %s144_s5 = sand.u32 (%p821_p5), 1, %s752_s11  }
  0x37   : > { %s571_s8 = sshll.u32 (%p821_p5), %s756_s12, 4  ;;  %s570_s14 = sshll.u32 (%p821_p5), %s144_s5, 7 }
  0x38   : > { %s150_s16 = ssub.s32 (%p821_p5), 38, %s571_s8  ;;  %s891_s24 = scalar_lea.sflag (%p821_p5), [#allocation6], %s144_s5 }
  0x39   : > { %p151_p7 = scmp.lt.s32.totalorder (%p821_p5), %s150_s16, 16  ;;  %s148_s27 = scalar_lea.vmem (%p821_p5), [#allocation5], %s570_s14 }
  0x3b   : > { %s1061_s16 = smov (!%p151_p7, %s150_s16), 16 }
  0x3c   : > { %s888_s17 = sshll.u32 %s1061_s16, 7 }
  0x3d   : > { %s155_s23 = ssub.s32 2048, %s888_s17 }
  0x3e   : > { %156 = vsyncadd %s891_s24, %s155_s23  ;;  %p573_p5 = scmp.ne.s32.totalorder %s888_s17, 0  ;;  %s588_s19 = sshll.u32 %s756_s12, 11 }
  0x3f   : > { %s899_s7 = scalar_lea.hbm %s1043_s1, %s588_s19  ;;  %s161_s25 = sshll.u32 %s148_s27, 4  ;;  %s901_s25 = int_to_ptr.vmem [resolvable:$true] %s161_s25 }
  0x40   : > { %s662_s26 = scalar_lea.hbm %s899_s7, %s888_s17  ;;  %s666_s3 = scalar_lea.hbm %s1043_s1, 4864 }
  0x41   : > { %p663_p9 = scmp.ne.s32.totalorder %s899_s7, %s662_s26  ;;  %p667_p2 = scmp.lt.s32.totalorder %s899_s7, %s1043_s1 }
  0x42   : > { %p668_p4 = scmp.lt.s32.totalorder %s666_s3, %s662_s26 }
  0x43   : > { %p664_p10 = pnand %p663_p9, %p573_p5 }
  0x44   : > { %p669_p8 = por %p668_p4, %p667_p2 }
  0x45   : > { %p665_p13 = pneg %p664_p10 }
  0x47   : > { %p670_p11 = pnand %p669_p8, %p665_p13 }
  0x49   : > { %673 = shalt.err (!%p670_p11)
}
  0x4a   : > { %s674_s8 = scalar_lea.vmem %s901_s25, %s888_s17  ;;  %s761_s14 = smov [#allocation5]  }
  0x4b   : > { %p675_p12 = scmp.ne.s32.totalorder %s901_s25, %s674_s8  ;;  %s678_s16 = sshll.u32 %s761_s14, 4  ;;  %s679_s16 = int_to_ptr.vmem [resolvable:$false] %s678_s16 }
  0x4c   : > { %s680_s23 = scalar_lea.vmem %s679_s16, 4096  ;;  %p681_p3 = scmp.lt.s32.totalorder %s901_s25, %s679_s16 }
  0x4d   : > { %p676_p0 = pnand %p675_p12, %p573_p5  ;;  %p682_p7 = scmp.lt.s32.totalorder %s680_s23, %s674_s8 }
  0x4f   : > { %p677_p1 = pneg %p676_p0  ;;  %p683_p9 = por %p682_p7, %p681_p3 }
  0x51   : > { %p684_p10 = pnand %p683_p9, %p677_p1 }
  0x53   : > { %687 = shalt.err (!%p684_p10)
}
  0x54   : > { %s762_s27 = smov 128   ;;  %s763_s19 = smov 8  }
  0x55   : > { %167 = dma.hbm_to_vmem [thread:$0]  (%p573_p5), %s899_s7, %s888_s17, %s901_s25, %s891_s24, %s762_s27, %s762_s27, %s763_s19  }
  0x56 PF: > { %p577_p13 = scmp.ge.s32.totalorder %s756_s12, 1  ;;  %p169_p2 = scmp.lt.s32.totalorder %s756_s12, 4 }
  0x58   : > { %p170_p4 = pnand %p577_p13, %p169_p2 }
  0x59   : > { %s930_s29 = sand.u32 (!%p170_p4), 1, %s748_s10  }
  0x5a   : > { %173 = sbr.rel (%p170_p4) target bundleno = 200 (0xc8), region = 28  ;;  %s578_s6 = sshll.u32 (!%p170_p4), %s930_s29, 7 }
  0x5b   : > { %s176_s26 = scalar_lea.sflag (!%p170_p4), [#allocation3], %s930_s29  ;;  %s934_s28 = scalar_lea.vmem (!%p170_p4), [#allocation2], %s578_s6 }
  0x5f   : > { %731 = dma.done.wait (%p825_p6), %s176_s26, 2048  }
  0x60   : > { %733 = vsyncadd (%p825_p6), %s176_s26, 4294965248  ;;  %s185_s17 = scalar_lea.sflag [#allocation6], %s930_s29  ;;  %s941_s24 = scalar_lea.vmem [#allocation5], %s578_s6 }
  0x61   : > { %735 = dma.done.wait (%p825_p6), %s185_s17, 2048  }
  0x62   : > { %737 = vsyncadd (%p825_p6), %s185_s17, 4294965248  ;;  %s580_s7 = sshll.u32 %s930_s29, 3  ;;  %p1051_p5 = scmp.eq.s32.totalorder %s803_s13, 2 }
  0x63   : > { %s948_s25 = scalar_lea.vmem [#allocation7], %s580_s7 }
  0x64   : > { %227 = sbr.rel (%p1051_p5) target bundleno = 141 (0x8d), region = 40 }
  0x69   : > { %v228_v0 = vld [vmem:[%s934_s28] sm:$0xff]  ;;  %v229_v1 = vld [vmem:[%s934_s28 + $0x8] sm:$0xff]  ;;  %v230_v2 = vld [vmem:[%s934_s28 + $0x10] sm:$0xff]  ;;  %v764_v29 = vmov 0  }
  0x6a   : > { %v231_v3 = vld [vmem:[%s934_s28 + $0x18] sm:$0xff]  ;;  %v232_v4 = vld [vmem:[%s934_s28 + $0x20] sm:$0xff]  ;;  %v233_v5 = vld [vmem:[%s934_s28 + $0x28] sm:$0xff] }
  0x6b   : > { %v234_v6 = vld [vmem:[%s934_s28 + $0x30] sm:$0xff]  ;;  %v235_v7 = vld [vmem:[%s934_s28 + $0x38] sm:$0xff]  ;;  %v236_v8 = vld [vmem:[%s934_s28 + $0x40] sm:$0xff] }
  0x6c   : > { %v237_v9 = vld [vmem:[%s934_s28 + $0x48] sm:$0xff]  ;;  %v238_v10 = vld [vmem:[%s934_s28 + $0x50] sm:$0xff]  ;;  %v244_v11 = vld [vmem:[%s941_s24] sm:$0xff] }
  0x6d   : > { %v245_v12 = vld [vmem:[%s941_s24 + $0x8] sm:$0xff]  ;;  %v239_v13 = vld [vmem:[%s934_s28 + $0x58] sm:$0xff]  ;;  %v240_v14 = vld [vmem:[%s934_s28 + $0x60] sm:$0xff]  ;;  %vm260_vm0 = vcmp.eq.s32.totalorder %v228_v0, %v244_v11 }
  0x6e   : > { %v246_v15 = vld [vmem:[%s941_s24 + $0x10] sm:$0xff]  ;;  %v247_v16 = vld [vmem:[%s941_s24 + $0x18] sm:$0xff]  ;;  %v248_v17 = vld [vmem:[%s941_s24 + $0x20] sm:$0xff]  ;;  %vm261_vm1 = vcmp.eq.s32.totalorder %v229_v1, %v245_v12  ;;  %v276_v30 = vsel %vm260_vm0, 1, %v764_v29 }
  0x6f   : > { %v241_v18 = vld [vmem:[%s934_s28 + $0x68] sm:$0xff]  ;;  %v250_v20 = vld [vmem:[%s941_s24 + $0x30] sm:$0xff]  ;;  %v251_v21 = vld [vmem:[%s941_s24 + $0x38] sm:$0xff]  ;;  %vm262_vm2 = vcmp.eq.s32.totalorder %v230_v2, %v246_v15  ;;  %vm263_vm3 = vcmp.eq.s32.totalorder %v231_v3, %v247_v16  ;;  %vm264_vm4 = vcmp.eq.s32.totalorder %v232_v4, %v248_v17  ;;  %v277_v31 = vsel %vm261_vm1, 1, %v764_v29 }
  0x70   : > { %v249_v19 = vld [vmem:[%s941_s24 + $0x28] sm:$0xff]  ;;  %v242_v22 = vld [vmem:[%s934_s28 + $0x70] sm:$0xff]  ;;  %v252_v23 = vld [vmem:[%s941_s24 + $0x40] sm:$0xff]  ;;  %vm266_vm6 = vcmp.eq.s32.totalorder %v234_v6, %v250_v20  ;;  %vm267_vm7 = vcmp.eq.s32.totalorder %v235_v7, %v251_v21  ;;  %v278_v35 = vsel %vm262_vm2, 1, %v764_v29  ;;  %v280_v36 = vsel %vm264_vm4, 1, %v764_v29 }
  0x71   : > { %v253_v24 = vld [vmem:[%s941_s24 + $0x48] sm:$0xff]  ;;  %v254_v25 = vld [vmem:[%s941_s24 + $0x50] sm:$0xff]  ;;  %vm265_vm5 = vcmp.eq.s32.totalorder %v233_v5, %v249_v19  ;;  %v255_v26 = vld [vmem:[%s941_s24 + $0x58] sm:$0xff]  ;;  %vm268_vm8 = vcmp.eq.s32.totalorder %v236_v8, %v252_v23  ;;  %v279_v38 = vsel %vm263_vm3, 1, %v764_v29  ;;  %v282_v39 = vsel %vm266_vm6, 1, %v764_v29 }
  0x72   : > { %v256_v27 = vld [vmem:[%s941_s24 + $0x60] sm:$0xff]  ;;  %v257_v28 = vld [vmem:[%s941_s24 + $0x68] sm:$0xff]  ;;  %v243_v32 = vld [vmem:[%s934_s28 + $0x78] sm:$0xff]  ;;  %vm269_vm9 = vcmp.eq.s32.totalorder %v237_v9, %v253_v24  ;;  %vm270_vm10 = vcmp.eq.s32.totalorder %v238_v10, %v254_v25  ;;  %vm271_vm11 = vcmp.eq.s32.totalorder %v239_v13, %v255_v26  ;;  %v281_v37 = vsel %vm265_vm5, 1, %v764_v29 }
  0x73   : > { %v258_v33 = vld [vmem:[%s941_s24 + $0x70] sm:$0xff]  ;;  %v259_v34 = vld [vmem:[%s941_s24 + $0x78] sm:$0xff]  ;;  %vm272_vm12 = vcmp.eq.s32.totalorder %v240_v14, %v256_v27  ;;  %vm273_vm13 = vcmp.eq.s32.totalorder %v241_v18, %v257_v28  ;;  %v283_v40 = vsel %vm267_vm7, 1, %v764_v29  ;;  %v284_v41 = vsel %vm268_vm8, 1, %v764_v29 }
  0x74   : > { %vm274_vm14 = vcmp.eq.s32.totalorder %v242_v22, %v258_v33  ;;  %vm275_vm15 = vcmp.eq.s32.totalorder %v243_v32, %v259_v34  ;;  %v285_v42 = vsel %vm269_vm9, 1, %v764_v29  ;;  %v286_v43 = vsel %vm270_vm10, 1, %v764_v29 }
  0x75   : > { %v287_v44 = vsel %vm271_vm11, 1, %v764_v29  ;;  %v292_v45 = vadd.s32 %v280_v36, %v276_v30  ;;  %v293_v46 = vadd.s32 %v281_v37, %v277_v31  ;;  %v288_v47 = vsel %vm272_vm12, 1, %v764_v29 }
  0x76   : > { %v289_v48 = vsel %vm273_vm13, 1, %v764_v29  ;;  %v294_v49 = vadd.s32 %v282_v39, %v278_v35  ;;  %v295_v50 = vadd.s32 %v283_v40, %v279_v38  ;;  %v290_v51 = vsel %vm274_vm14, 1, %v764_v29 }
  0x77   : > { %v291_v52 = vsel %vm275_vm15, 1, %v764_v29  ;;  %v296_v53 = vadd.s32 %v292_v45, %v284_v41  ;;  %v297_v54 = vadd.s32 %v293_v46, %v285_v42 }
  0x78   : > { %v298_v55 = vadd.s32 %v294_v49, %v286_v43  ;;  %v299_v56 = vadd.s32 %v295_v50, %v287_v44 }
  0x79   : > { %v300_v57 = vadd.s32 %v296_v53, %v288_v47  ;;  %v301_v58 = vadd.s32 %v297_v54, %v289_v48 }
  0x7a   : > { %v302_v59 = vadd.s32 %v298_v55, %v290_v51  ;;  %v303_v60 = vadd.s32 %v299_v56, %v291_v52 }
  0x7b   : > { %v304_v61 = vadd.s32 %v301_v58, %v300_v57 }
  0x7c   : > { %v305_v62 = vadd.s32 %v303_v60, %v302_v59 }
  0x7e   : > { %v306_v63 = vadd.s32 %v305_v62, %v304_v61 }
  0x80   : > { %v307_v0 = vrot.slane %v306_v63, 4 }
  0x82   : > { %v308_v1 = vadd.s32 %v307_v0, %v306_v63 }
  0x84   : > { %v309_v2 = vrot.slane %v308_v1, 2 }
  0x86   : > { %v310_v3 = vadd.s32 %v309_v2, %v308_v1 }
  0x88   : > { %v311_v4 = vrot.slane %v310_v3, 1 }
  0x8a   : > { %v312_v5 = vadd.s32 %v311_v4, %v310_v3 }
  0x8c   : > { %313 = vst [vmem:[%s948_s25] sm:$0xff] %v312_v5 }
  0x8d PF: > { %p582_p6 = scmp.ne.s32.totalorder %s803_s13, 2 }
  0x8f   : > { %317 = sbr.rel (%p582_p6) target bundleno = 176 (0xb0), region = 44 }
  0x94   : > { %v318_v6 = vld [vmem:[%s934_s28] sm:$0xff]  ;;  %v319_v7 = vld [vmem:[%s934_s28 + $0x8] sm:$0xff]  ;;  %v320_v8 = vld [vmem:[%s934_s28 + $0x10] sm:$0xff]  ;;  %v366_v9 = vlaneseq  ;;  %v765_v21 = vmov 0  }
  0x95   : > { %v321_v10 = vld [vmem:[%s934_s28 + $0x18] sm:$0xff]  ;;  %v322_v11 = vld [vmem:[%s934_s28 + $0x20] sm:$0xff]  ;;  %v323_v12 = vld [vmem:[%s934_s28 + $0x28] sm:$0xff] }
  0x96   : > { %v334_v13 = vld [vmem:[%s941_s24] sm:$0xff]  ;;  %v335_v14 = vld [vmem:[%s941_s24 + $0x8] sm:$0xff]  ;;  %v336_v15 = vld [vmem:[%s941_s24 + $0x10] sm:$0xff]  ;;  %v367_v16 = vshrl.u32 %v366_v9, 7 }
  0x97   : > { %v337_v17 = vld [vmem:[%s941_s24 + $0x18] sm:$0xff]  ;;  %v338_v18 = vld [vmem:[%s941_s24 + $0x20] sm:$0xff]  ;;  %v339_v19 = vld [vmem:[%s941_s24 + $0x28] sm:$0xff]  ;;  %vm350_vm0 = vcmp.eq.s32.totalorder %v318_v6, %v334_v13  ;;  %vm351_vm1 = vcmp.eq.s32.totalorder %v319_v7, %v335_v14  ;;  %vm352_vm2 = vcmp.eq.s32.totalorder %v320_v8, %v336_v15 }
  0x98   : > { %vm353_vm3 = vcmp.eq.s32.totalorder %v321_v10, %v337_v17  ;;  %vm354_vm4 = vcmp.eq.s32.totalorder %v322_v11, %v338_v18  ;;  %vm355_vm5 = vcmp.eq.s32.totalorder %v323_v12, %v339_v19  ;;  %v372_v20 = vadd.s32 40, %v367_v16 }
  0x99   : > { %v415_v22 = vsel %vm350_vm0, 1, %v765_v21  ;;  %v416_v23 = vsel %vm351_vm1, 1, %v765_v21  ;;  %v417_v24 = vsel %vm352_vm2, 1, %v765_v21  ;;  %v418_v25 = vsel %vm353_vm3, 1, %v765_v21 }
  0x9a   : > { %vm388_vm6 = vcmp.lt.s32.totalorder %v372_v20, 44  ;;  %v419_v26 = vsel %vm354_vm4, 1, %v765_v21  ;;  %v444_v30 = vadd.s32 %v418_v25, %v417_v24 }
  0x9b   : > { %vm404_vm7 = vmand %vm355_vm5, %vm388_vm6  ;;  %v431_v27 = vadd.s32 %v419_v26, %v415_v22 }
  0x9c   : > { %v420_v28 = vsel %vm404_vm7, 1, %v765_v21 }
  0x9d   : > { %v432_v29 = vadd.s32 %v420_v28, %v416_v23 }
  0x9f   : > { %v443_v31 = vadd.s32 %v432_v29, %v431_v27 }
  0xa1   : > { %v445_v32 = vadd.s32 %v444_v30, %v443_v31 }
  0xa3   : > { %v446_v33 = vrot.slane %v445_v32, 4 }
  0xa5   : > { %v447_v34 = vadd.s32 %v446_v33, %v445_v32 }
  0xa7   : > { %v448_v35 = vrot.slane %v447_v34, 2 }
  0xa9   : > { %v449_v36 = vadd.s32 %v448_v35, %v447_v34 }
  0xab   : > { %v450_v37 = vrot.slane %v449_v36, 1 }
  0xad   : > { %v451_v38 = vadd.s32 %v450_v37, %v449_v36 }
  0xaf   : > { %452 = vst [vmem:[%s948_s25] sm:$0xff] %v451_v38 }
  0xb0 PF: > { %s584_s20 = sshll.u32 %s803_s13, 7  ;;  %s467_s5 = sshll.u32 %s948_s25, 4  ;;  %s468_s5 = int_to_ptr.vmem [resolvable:$true] %s467_s5 }
  0xb1   : > { %s465_s4 = scalar_lea.hbm %s1044_s2, %s584_s20  ;;  %s454_s8 = scalar_lea.sflag [#allocation4], %s930_s29 }
  0xb2   : > { %s688_s14 = scalar_lea.vmem %s468_s5, 128  ;;  %p1052_p11 = scmp.ne.s32.totalorder %s1049_s21, 0 }
  0xb3   : > { %p689_p8 = scmp.ne.s32.totalorder %s468_s5, %s688_s14  ;;  %s766_s16 = smov [#allocation7]  }
  0xb4   : > { %s692_s23 = sshll.u32 %s766_s16, 4  ;;  %s693_s23 = int_to_ptr.vmem [resolvable:$false] %s692_s23 }
  0xb5   : > { %p690_p12 = pnand %p689_p8, %p1052_p11  ;;  %s694_s27 = scalar_lea.vmem %s693_s23, 256 }
  0xb6   : > { %p695_p1 = scmp.lt.s32.totalorder %s468_s5, %s693_s23  ;;  %p696_p3 = scmp.lt.s32.totalorder %s694_s27, %s688_s14 }
  0xb7   : > { %p691_p0 = pneg %p690_p12 }
  0xb8   : > { %p697_p7 = por %p696_p3, %p695_p1 }
  0xba   : > { %p698_p9 = pnand %p697_p7, %p691_p0 }
  0xbc   : > { %701 = shalt.err (!%p698_p9)
}
  0xbd   : > { %s702_s13 = scalar_lea.hbm %s465_s4, 128  ;;  %s706_s6 = scalar_lea.hbm %s1044_s2, 384 }
  0xbe   : > { %p703_p10 = scmp.ne.s32.totalorder %s465_s4, %s702_s13  ;;  %p707_p4 = scmp.lt.s32.totalorder %s465_s4, %s1044_s2 }
  0xbf   : > { %p708_p5 = scmp.lt.s32.totalorder %s706_s6, %s702_s13 }
  0xc0   : > { %p704_p13 = pnand %p703_p10, %p1052_p11 }
  0xc1   : > { %p709_p6 = por %p708_p5, %p707_p4 }
  0xc2   : > { %p705_p2 = pneg %p704_p13 }
  0xc4   : > { %p710_p8 = pnand %p709_p6, %p705_p2 }
  0xc6   : > { %713 = shalt.err (!%p710_p8)
}
  0xc7   : > { %591 = dma.vmem_to_hbm [thread:$0]  (%p1052_p11), %s468_s5, 128, %s465_s4, %s454_s8  }
  0xc8 PF: > { %p597_p12 = scmp.ge.s32.totalorder %s756_s12, 2  ;;  %s479_s17 = sand.u32 1, %s744_s9  }
  0xc9   : > { %p1053_p0 = scmp.ne.s32.totalorder %s1050_s22, 0  ;;  %s480_s24 = scalar_lea.sflag [#allocation4], %s479_s17 }
  0xcb   : > { %p594_p1 = pnand %p597_p12, %p1053_p0 }
  0xcd   : > { %p595_p3 = pneg %p594_p1 }
  0xcf   : > { %739 = dma.done.wait (%p595_p3), %s480_s24, 128  }
  0xd0   : > { %741 = vsyncadd (%p595_p3), %s480_s24, 4294967168  ;;  %p18_p7 = scmp.ge.s32.totalorder %s807_s15, 5   ;;  %s1054_s9 = smov %s748_s10 }
  0xd1   : > { %s1055_s10 = smov %s752_s11  ;;  %s1056_s11 = smov %s819_s18 }
  0xd2   : > { %s1057_s12 = smov %s807_s15  ;;  %20 = sbr.rel (!%p18_p7) target bundleno = 7 (0x7), region = 94 }
  0xd7   :  { %485 = vsyncpa [#allocation3], 1 }
  0xd8   :  { %487 = vsyncpa [#allocation3 + $0x1], 1 }
  0xd9   :  { %488 = vsyncpa [#allocation6], 1 }
  0xda   :  { %490 = vsyncpa [#allocation6 + $0x1], 1 }
  0xdb   :  { %491 = vsyncpa [#allocation4], 1 }
  0xdc   :  { %493 = vsyncpa [#allocation4 + $0x1], 1 }

</bundles_post_ra>
